<compile_context>
chip_gen: v7x
topology: tpu7x:2x2x1
jax: 0.10.0
libtpu: 0.0.40
codegen_flags: <defaults>
</compile_context>

<pallas_src>
import numpy as np
import jax
import jax.numpy as jnp
from jax.experimental import pallas as pl
from jax.experimental.pallas import tpu as pltpu

# ---- static geometry (small shapes consistent with the module) -------------------------
B, S, D = 2, 16, 64                      # batch, seq, hidden  (last_hidden_state shape)
KH = KW = 3                              # Conv2d(1, 1, kernel_size=(3, 3)), valid padding
Hc, Wc = S - KH + 1, D - KW + 1          # conv output: (14, 62)
PKH, PKW = 4, 4                          # MaxPool2d kernel (4, 4)
SH, SW = 2, 25                           # MaxPool2d stride (2, 25)
Hp = (Hc - PKH) // SH + 1                # pooled height = 6
Wp = (Wc - PKW) // SW + 1                # pooled width  = 3
HR = Hc - PKH + 1                        # valid row-window starts = 11
OH = OW = 28                             # Upsample(size=(28, 28)), mode='nearest'
NPOOL = Hp * Wp                          # 18 pooled values per batch
NOUT = OH * OW                           # 784 output pixels per batch


def decoder_head_kernel(x_ref, wb_ref, up_ref, o_ref):
    # x_ref: (B, S, D) VMEM.  wb_ref: (10,) SMEM = [w00..w22, bias].
    # up_ref: (18, 784) VMEM one-hot duplication matrix.  o_ref: (B, 784) VMEM.
    pooled_rows = []
    for b in range(B):                                       # static unroll (B = 2)
        x = x_ref[b]                                         # (S, D) = (16, 64)

        # --- Conv2d(1,1,3x3), no padding (cross-correlation, as in PyTorch) ---
        # Hoist the lane (dj) shifts out of the di loop; initialize with the bias.
        xs = [x[:, dj:dj + Wc] for dj in range(KW)]          # 3 x (S, Wc)
        conv = jnp.full((Hc, Wc), wb_ref[KH * KW], jnp.float32)
        for di in range(KH):
            for dj in range(KW):
                conv = conv + wb_ref[di * KW + dj] * xs[dj][di:di + Hc, :]

        # --- MaxPool2d((4,4), stride=(2,25)) on the VPU -------------------------------
        # Row window max: r[i, :] = max_{dp<4} conv[i+dp, :]   (3 sublane-shifted maxima)
        r = conv[0:HR, :]
        for dp in range(1, PKH):
            r = jnp.maximum(r, conv[dp:dp + HR, :])
        # Column window max: only the 3 window starts {0, 25, 50} are ever needed.
        cols = [jnp.max(r[:, q * SW:q * SW + PKW], axis=1, keepdims=True)
                for q in range(Wp)]                          # 3 x (HR, 1)
        cm = jnp.concatenate(cols, axis=1)                   # (HR, Wp) = (11, 3)

        # Pick the stride-2 pooled rows and flatten into lanes: lane m = 3*p + q.
        pooled_rows.append(
            jnp.concatenate([cm[SH * p:SH * p + 1, :] for p in range(Hp)], axis=1))  # (1, 18)

    pooled = jnp.concatenate(pooled_rows, axis=0)            # (B, 18)
    pooled = jnp.maximum(pooled, 0.0)                        # ReLU (commutes with upsample)

    # --- Nearest Upsample(28,28), emitted directly as a lane-dense (B, 784) slab ------
    # One-hot duplication matmul; HIGHEST keeps the f32 values exact through the MXU.
    o_ref[...] = jnp.dot(pooled, up_ref[...],
                         preferred_element_type=jnp.float32,
                         precision=jax.lax.Precision.HIGHEST)


def build_upsample_matrix():
    # nearest-neighbour source index (PyTorch 'nearest'): src = floor(dst * in / out)
    src_h = (np.arange(OH) * Hp) // OH
    src_w = (np.arange(OW) * Wp) // OW
    U = np.zeros((NPOOL, NOUT), np.float32)
    for i in range(OH):
        for j in range(OW):
            U[src_h[i] * Wp + src_w[j], i * OW + j] = 1.0
    return jnp.asarray(U)


def decoder_head(x, w, b, up):
    wb = jnp.concatenate([w.reshape(-1), b.reshape(-1)]).astype(jnp.float32)   # (10,)
    out_flat = pl.pallas_call(
        decoder_head_kernel,
        out_shape=jax.ShapeDtypeStruct((B, NOUT), jnp.float32),
        in_specs=[
            pl.BlockSpec(memory_space=pltpu.MemorySpace.VMEM),   # x (B, S, D)
            pl.BlockSpec(memory_space=pltpu.MemorySpace.SMEM),   # wb (10,) = weights + bias
            pl.BlockSpec(memory_space=pltpu.MemorySpace.VMEM),   # up (18, 784) one-hot
        ],
        out_specs=pl.BlockSpec(memory_space=pltpu.MemorySpace.VMEM),
    )(x, wb, up)
    return out_flat.reshape(B, 1, OH, OW)


if __name__ == "__main__":
    key = jax.random.PRNGKey(0)
    kx, kw, kb = jax.random.split(key, 3)
    x = jax.random.normal(kx, (B, S, D), jnp.float32)          # .last_hidden_state
    w = jax.random.normal(kw, (KH, KW), jnp.float32) / 3.0     # Conv2d(1,1,3,3) weight
    b = jax.random.normal(kb, (1,), jnp.float32) * 0.1         # Conv2d bias

    up = build_upsample_matrix()
    out = jax.block_until_ready(decoder_head(x, w, b, up))

    # ---- pure numpy reference of the PyTorch forward pass -----------------------------
    xn, wn, bn = np.asarray(x), np.asarray(w), float(np.asarray(b)[0])
    conv = np.zeros((B, Hc, Wc), np.float32)
    for di in range(KH):
        for dj in range(KW):
            conv += wn[di, dj] * xn[:, di:di + Hc, dj:dj + Wc]
    conv += bn
    pooled = np.zeros((B, Hp, Wp), np.float32)
    for p in range(Hp):
        for q in range(Wp):
            pooled[:, p, q] = conv[:, SH * p:SH * p + PKH, SW * q:SW * q + PKW].max(axis=(1, 2))
    pooled = np.maximum(pooled, 0.0)
    src_h = (np.arange(OH) * Hp) // OH
    src_w = (np.arange(OW) * Wp) // OW
    ref = pooled[:, src_h, :][:, :, src_w][:, None, :, :]      # (B, 1, 28, 28)

    np.testing.assert_allclose(np.asarray(out), ref, rtol=1e-4, atol=1e-4)
    print("KERNEL_OK")
</pallas_src>

<mosaic_0001>
module attributes {stable_mosaic.version = 11 : i64} {
  func.func @decoder_head_kernel(%arg0: memref<2x16x64xf32, #tpu.memory_space<vmem>>, %arg1: memref<10xf32, #tpu.memory_space<smem>>, %arg2: memref<18x784xf32, #tpu.memory_space<vmem>>, %arg3: memref<2x784xf32, #tpu.memory_space<vmem>>) attributes {dimension_semantics = [], scalar_prefetch = 0 : i64, scratch_operands = 0 : i64, tpu.core_type = #tpu.core_type<tc>} {
    %c0 = arith.constant 0 : index
    %c0_0 = arith.constant 0 : index
    %c0_1 = arith.constant 0 : index
    %0 = vector.load %arg0[%c0, %c0_0, %c0_1] : memref<2x16x64xf32, #tpu.memory_space<vmem>>, vector<1x16x64xf32>
    %1 = vector.shape_cast %0 : vector<1x16x64xf32> to vector<16x64xf32>
    %2 = vector.extract_strided_slice %1 {offsets = [0, 0], sizes = [16, 62], strides = [1, 1]} : vector<16x64xf32> to vector<16x62xf32>
    %3 = vector.extract_strided_slice %1 {offsets = [0, 1], sizes = [16, 62], strides = [1, 1]} : vector<16x64xf32> to vector<16x62xf32>
    %4 = vector.extract_strided_slice %1 {offsets = [0, 2], sizes = [16, 62], strides = [1, 1]} : vector<16x64xf32> to vector<16x62xf32>
    %c9 = arith.constant 9 : index
    %5 = memref.load %arg1[%c9] : memref<10xf32, #tpu.memory_space<smem>>
    %6 = vector.broadcast %5 : f32 to vector<14x62xf32>
    %c0_2 = arith.constant 0 : index
    %7 = memref.load %arg1[%c0_2] : memref<10xf32, #tpu.memory_space<smem>>
    %8 = vector.extract_strided_slice %2 {offsets = [0, 0], sizes = [14, 62], strides = [1, 1]} : vector<16x62xf32> to vector<14x62xf32>
    %9 = vector.broadcast %7 : f32 to vector<14x62xf32>
    %10 = arith.mulf %9, %8 : vector<14x62xf32>
    %11 = arith.addf %6, %10 : vector<14x62xf32>
    %c1 = arith.constant 1 : index
    %12 = memref.load %arg1[%c1] : memref<10xf32, #tpu.memory_space<smem>>
    %13 = vector.extract_strided_slice %3 {offsets = [0, 0], sizes = [14, 62], strides = [1, 1]} : vector<16x62xf32> to vector<14x62xf32>
    %14 = vector.broadcast %12 : f32 to vector<14x62xf32>
    %15 = arith.mulf %14, %13 : vector<14x62xf32>
    %16 = arith.addf %11, %15 : vector<14x62xf32>
    %c2 = arith.constant 2 : index
    %17 = memref.load %arg1[%c2] : memref<10xf32, #tpu.memory_space<smem>>
    %18 = vector.extract_strided_slice %4 {offsets = [0, 0], sizes = [14, 62], strides = [1, 1]} : vector<16x62xf32> to vector<14x62xf32>
    %19 = vector.broadcast %17 : f32 to vector<14x62xf32>
    %20 = arith.mulf %19, %18 : vector<14x62xf32>
    %21 = arith.addf %16, %20 : vector<14x62xf32>
    %c3 = arith.constant 3 : index
    %22 = memref.load %arg1[%c3] : memref<10xf32, #tpu.memory_space<smem>>
    %23 = vector.extract_strided_slice %2 {offsets = [1, 0], sizes = [14, 62], strides = [1, 1]} : vector<16x62xf32> to vector<14x62xf32>
    %24 = vector.broadcast %22 : f32 to vector<14x62xf32>
    %25 = arith.mulf %24, %23 : vector<14x62xf32>
    %26 = arith.addf %21, %25 : vector<14x62xf32>
    %c4 = arith.constant 4 : index
    %27 = memref.load %arg1[%c4] : memref<10xf32, #tpu.memory_space<smem>>
    %28 = vector.extract_strided_slice %3 {offsets = [1, 0], sizes = [14, 62], strides = [1, 1]} : vector<16x62xf32> to vector<14x62xf32>
    %29 = vector.broadcast %27 : f32 to vector<14x62xf32>
    %30 = arith.mulf %29, %28 : vector<14x62xf32>
    %31 = arith.addf %26, %30 : vector<14x62xf32>
    %c5 = arith.constant 5 : index
    %32 = memref.load %arg1[%c5] : memref<10xf32, #tpu.memory_space<smem>>
    %33 = vector.extract_strided_slice %4 {offsets = [1, 0], sizes = [14, 62], strides = [1, 1]} : vector<16x62xf32> to vector<14x62xf32>
    %34 = vector.broadcast %32 : f32 to vector<14x62xf32>
    %35 = arith.mulf %34, %33 : vector<14x62xf32>
    %36 = arith.addf %31, %35 : vector<14x62xf32>
    %c6 = arith.constant 6 : index
    %37 = memref.load %arg1[%c6] : memref<10xf32, #tpu.memory_space<smem>>
    %38 = vector.extract_strided_slice %2 {offsets = [2, 0], sizes = [14, 62], strides = [1, 1]} : vector<16x62xf32> to vector<14x62xf32>
    %39 = vector.broadcast %37 : f32 to vector<14x62xf32>
    %40 = arith.mulf %39, %38 : vector<14x62xf32>
    %41 = arith.addf %36, %40 : vector<14x62xf32>
    %c7 = arith.constant 7 : index
    %42 = memref.load %arg1[%c7] : memref<10xf32, #tpu.memory_space<smem>>
    %43 = vector.extract_strided_slice %3 {offsets = [2, 0], sizes = [14, 62], strides = [1, 1]} : vector<16x62xf32> to vector<14x62xf32>
    %44 = vector.broadcast %42 : f32 to vector<14x62xf32>
    %45 = arith.mulf %44, %43 : vector<14x62xf32>
    %46 = arith.addf %41, %45 : vector<14x62xf32>
    %c8 = arith.constant 8 : index
    %47 = memref.load %arg1[%c8] : memref<10xf32, #tpu.memory_space<smem>>
    %48 = vector.extract_strided_slice %4 {offsets = [2, 0], sizes = [14, 62], strides = [1, 1]} : vector<16x62xf32> to vector<14x62xf32>
    %49 = vector.broadcast %47 : f32 to vector<14x62xf32>
    %50 = arith.mulf %49, %48 : vector<14x62xf32>
    %51 = arith.addf %46, %50 : vector<14x62xf32>
    %52 = vector.extract_strided_slice %51 {offsets = [0, 0], sizes = [11, 62], strides = [1, 1]} : vector<14x62xf32> to vector<11x62xf32>
    %53 = vector.extract_strided_slice %51 {offsets = [1, 0], sizes = [11, 62], strides = [1, 1]} : vector<14x62xf32> to vector<11x62xf32>
    %54 = arith.maximumf %52, %53 : vector<11x62xf32>
    %55 = vector.extract_strided_slice %51 {offsets = [2, 0], sizes = [11, 62], strides = [1, 1]} : vector<14x62xf32> to vector<11x62xf32>
    %56 = arith.maximumf %54, %55 : vector<11x62xf32>
    %57 = vector.extract_strided_slice %51 {offsets = [3, 0], sizes = [11, 62], strides = [1, 1]} : vector<14x62xf32> to vector<11x62xf32>
    %58 = arith.maximumf %56, %57 : vector<11x62xf32>
    %59 = vector.extract_strided_slice %58 {offsets = [0, 0], sizes = [11, 4], strides = [1, 1]} : vector<11x62xf32> to vector<11x4xf32>
    %cst = arith.constant dense<0xFF800000> : vector<11xf32>
    %60 = vector.multi_reduction <maximumf>, %59, %cst [1] : vector<11x4xf32> to vector<11xf32>
    %61 = vector.shape_cast %60 : vector<11xf32> to vector<11x1xf32>
    %62 = vector.extract_strided_slice %58 {offsets = [0, 25], sizes = [11, 4], strides = [1, 1]} : vector<11x62xf32> to vector<11x4xf32>
    %cst_3 = arith.constant dense<0xFF800000> : vector<11xf32>
    %63 = vector.multi_reduction <maximumf>, %62, %cst_3 [1] : vector<11x4xf32> to vector<11xf32>
    %64 = vector.shape_cast %63 : vector<11xf32> to vector<11x1xf32>
    %65 = vector.extract_strided_slice %58 {offsets = [0, 50], sizes = [11, 4], strides = [1, 1]} : vector<11x62xf32> to vector<11x4xf32>
    %cst_4 = arith.constant dense<0xFF800000> : vector<11xf32>
    %66 = vector.multi_reduction <maximumf>, %65, %cst_4 [1] : vector<11x4xf32> to vector<11xf32>
    %67 = vector.shape_cast %66 : vector<11xf32> to vector<11x1xf32>
    %68 = tpu.concatenate %61, %64, %67 in 1 : vector<11x1xf32>, vector<11x1xf32>, vector<11x1xf32> -> vector<11x3xf32>
    %69 = vector.extract_strided_slice %68 {offsets = [0, 0], sizes = [1, 3], strides = [1, 1]} : vector<11x3xf32> to vector<1x3xf32>
    %70 = vector.extract_strided_slice %68 {offsets = [2, 0], sizes = [1, 3], strides = [1, 1]} : vector<11x3xf32> to vector<1x3xf32>
    %71 = vector.extract_strided_slice %68 {offsets = [4, 0], sizes = [1, 3], strides = [1, 1]} : vector<11x3xf32> to vector<1x3xf32>
    %72 = vector.extract_strided_slice %68 {offsets = [6, 0], sizes = [1, 3], strides = [1, 1]} : vector<11x3xf32> to vector<1x3xf32>
    %73 = vector.extract_strided_slice %68 {offsets = [8, 0], sizes = [1, 3], strides = [1, 1]} : vector<11x3xf32> to vector<1x3xf32>
    %74 = vector.extract_strided_slice %68 {offsets = [10, 0], sizes = [1, 3], strides = [1, 1]} : vector<11x3xf32> to vector<1x3xf32>
    %75 = tpu.concatenate %69, %70, %71, %72, %73, %74 in 1 : vector<1x3xf32>, vector<1x3xf32>, vector<1x3xf32>, vector<1x3xf32>, vector<1x3xf32>, vector<1x3xf32> -> vector<1x18xf32>
    %c1_5 = arith.constant 1 : index
    %c0_6 = arith.constant 0 : index
    %c0_7 = arith.constant 0 : index
    %76 = vector.load %arg0[%c1_5, %c0_6, %c0_7] : memref<2x16x64xf32, #tpu.memory_space<vmem>>, vector<1x16x64xf32>
    %77 = vector.shape_cast %76 : vector<1x16x64xf32> to vector<16x64xf32>
    %78 = vector.extract_strided_slice %77 {offsets = [0, 0], sizes = [16, 62], strides = [1, 1]} : vector<16x64xf32> to vector<16x62xf32>
    %79 = vector.extract_strided_slice %77 {offsets = [0, 1], sizes = [16, 62], strides = [1, 1]} : vector<16x64xf32> to vector<16x62xf32>
    %80 = vector.extract_strided_slice %77 {offsets = [0, 2], sizes = [16, 62], strides = [1, 1]} : vector<16x64xf32> to vector<16x62xf32>
    %c9_8 = arith.constant 9 : index
    %81 = memref.load %arg1[%c9_8] : memref<10xf32, #tpu.memory_space<smem>>
    %82 = vector.broadcast %81 : f32 to vector<14x62xf32>
    %c0_9 = arith.constant 0 : index
    %83 = memref.load %arg1[%c0_9] : memref<10xf32, #tpu.memory_space<smem>>
    %84 = vector.extract_strided_slice %78 {offsets = [0, 0], sizes = [14, 62], strides = [1, 1]} : vector<16x62xf32> to vector<14x62xf32>
    %85 = vector.broadcast %83 : f32 to vector<14x62xf32>
    %86 = arith.mulf %85, %84 : vector<14x62xf32>
    %87 = arith.addf %82, %86 : vector<14x62xf32>
    %c1_10 = arith.constant 1 : index
    %88 = memref.load %arg1[%c1_10] : memref<10xf32, #tpu.memory_space<smem>>
    %89 = vector.extract_strided_slice %79 {offsets = [0, 0], sizes = [14, 62], strides = [1, 1]} : vector<16x62xf32> to vector<14x62xf32>
    %90 = vector.broadcast %88 : f32 to vector<14x62xf32>
    %91 = arith.mulf %90, %89 : vector<14x62xf32>
    %92 = arith.addf %87, %91 : vector<14x62xf32>
    %c2_11 = arith.constant 2 : index
    %93 = memref.load %arg1[%c2_11] : memref<10xf32, #tpu.memory_space<smem>>
    %94 = vector.extract_strided_slice %80 {offsets = [0, 0], sizes = [14, 62], strides = [1, 1]} : vector<16x62xf32> to vector<14x62xf32>
    %95 = vector.broadcast %93 : f32 to vector<14x62xf32>
    %96 = arith.mulf %95, %94 : vector<14x62xf32>
    %97 = arith.addf %92, %96 : vector<14x62xf32>
    %c3_12 = arith.constant 3 : index
    %98 = memref.load %arg1[%c3_12] : memref<10xf32, #tpu.memory_space<smem>>
    %99 = vector.extract_strided_slice %78 {offsets = [1, 0], sizes = [14, 62], strides = [1, 1]} : vector<16x62xf32> to vector<14x62xf32>
    %100 = vector.broadcast %98 : f32 to vector<14x62xf32>
    %101 = arith.mulf %100, %99 : vector<14x62xf32>
    %102 = arith.addf %97, %101 : vector<14x62xf32>
    %c4_13 = arith.constant 4 : index
    %103 = memref.load %arg1[%c4_13] : memref<10xf32, #tpu.memory_space<smem>>
    %104 = vector.extract_strided_slice %79 {offsets = [1, 0], sizes = [14, 62], strides = [1, 1]} : vector<16x62xf32> to vector<14x62xf32>
    %105 = vector.broadcast %103 : f32 to vector<14x62xf32>
    %106 = arith.mulf %105, %104 : vector<14x62xf32>
    %107 = arith.addf %102, %106 : vector<14x62xf32>
    %c5_14 = arith.constant 5 : index
    %108 = memref.load %arg1[%c5_14] : memref<10xf32, #tpu.memory_space<smem>>
    %109 = vector.extract_strided_slice %80 {offsets = [1, 0], sizes = [14, 62], strides = [1, 1]} : vector<16x62xf32> to vector<14x62xf32>
    %110 = vector.broadcast %108 : f32 to vector<14x62xf32>
    %111 = arith.mulf %110, %109 : vector<14x62xf32>
    %112 = arith.addf %107, %111 : vector<14x62xf32>
    %c6_15 = arith.constant 6 : index
    %113 = memref.load %arg1[%c6_15] : memref<10xf32, #tpu.memory_space<smem>>
    %114 = vector.extract_strided_slice %78 {offsets = [2, 0], sizes = [14, 62], strides = [1, 1]} : vector<16x62xf32> to vector<14x62xf32>
    %115 = vector.broadcast %113 : f32 to vector<14x62xf32>
    %116 = arith.mulf %115, %114 : vector<14x62xf32>
    %117 = arith.addf %112, %116 : vector<14x62xf32>
    %c7_16 = arith.constant 7 : index
    %118 = memref.load %arg1[%c7_16] : memref<10xf32, #tpu.memory_space<smem>>
    %119 = vector.extract_strided_slice %79 {offsets = [2, 0], sizes = [14, 62], strides = [1, 1]} : vector<16x62xf32> to vector<14x62xf32>
    %120 = vector.broadcast %118 : f32 to vector<14x62xf32>
    %121 = arith.mulf %120, %119 : vector<14x62xf32>
    %122 = arith.addf %117, %121 : vector<14x62xf32>
    %c8_17 = arith.constant 8 : index
    %123 = memref.load %arg1[%c8_17] : memref<10xf32, #tpu.memory_space<smem>>
    %124 = vector.extract_strided_slice %80 {offsets = [2, 0], sizes = [14, 62], strides = [1, 1]} : vector<16x62xf32> to vector<14x62xf32>
    %125 = vector.broadcast %123 : f32 to vector<14x62xf32>
    %126 = arith.mulf %125, %124 : vector<14x62xf32>
    %127 = arith.addf %122, %126 : vector<14x62xf32>
    %128 = vector.extract_strided_slice %127 {offsets = [0, 0], sizes = [11, 62], strides = [1, 1]} : vector<14x62xf32> to vector<11x62xf32>
    %129 = vector.extract_strided_slice %127 {offsets = [1, 0], sizes = [11, 62], strides = [1, 1]} : vector<14x62xf32> to vector<11x62xf32>
    %130 = arith.maximumf %128, %129 : vector<11x62xf32>
    %131 = vector.extract_strided_slice %127 {offsets = [2, 0], sizes = [11, 62], strides = [1, 1]} : vector<14x62xf32> to vector<11x62xf32>
    %132 = arith.maximumf %130, %131 : vector<11x62xf32>
    %133 = vector.extract_strided_slice %127 {offsets = [3, 0], sizes = [11, 62], strides = [1, 1]} : vector<14x62xf32> to vector<11x62xf32>
    %134 = arith.maximumf %132, %133 : vector<11x62xf32>
    %135 = vector.extract_strided_slice %134 {offsets = [0, 0], sizes = [11, 4], strides = [1, 1]} : vector<11x62xf32> to vector<11x4xf32>
    %cst_18 = arith.constant dense<0xFF800000> : vector<11xf32>
    %136 = vector.multi_reduction <maximumf>, %135, %cst_18 [1] : vector<11x4xf32> to vector<11xf32>
    %137 = vector.shape_cast %136 : vector<11xf32> to vector<11x1xf32>
    %138 = vector.extract_strided_slice %134 {offsets = [0, 25], sizes = [11, 4], strides = [1, 1]} : vector<11x62xf32> to vector<11x4xf32>
    %cst_19 = arith.constant dense<0xFF800000> : vector<11xf32>
    %139 = vector.multi_reduction <maximumf>, %138, %cst_19 [1] : vector<11x4xf32> to vector<11xf32>
    %140 = vector.shape_cast %139 : vector<11xf32> to vector<11x1xf32>
    %141 = vector.extract_strided_slice %134 {offsets = [0, 50], sizes = [11, 4], strides = [1, 1]} : vector<11x62xf32> to vector<11x4xf32>
    %cst_20 = arith.constant dense<0xFF800000> : vector<11xf32>
    %142 = vector.multi_reduction <maximumf>, %141, %cst_20 [1] : vector<11x4xf32> to vector<11xf32>
    %143 = vector.shape_cast %142 : vector<11xf32> to vector<11x1xf32>
    %144 = tpu.concatenate %137, %140, %143 in 1 : vector<11x1xf32>, vector<11x1xf32>, vector<11x1xf32> -> vector<11x3xf32>
    %145 = vector.extract_strided_slice %144 {offsets = [0, 0], sizes = [1, 3], strides = [1, 1]} : vector<11x3xf32> to vector<1x3xf32>
    %146 = vector.extract_strided_slice %144 {offsets = [2, 0], sizes = [1, 3], strides = [1, 1]} : vector<11x3xf32> to vector<1x3xf32>
    %147 = vector.extract_strided_slice %144 {offsets = [4, 0], sizes = [1, 3], strides = [1, 1]} : vector<11x3xf32> to vector<1x3xf32>
    %148 = vector.extract_strided_slice %144 {offsets = [6, 0], sizes = [1, 3], strides = [1, 1]} : vector<11x3xf32> to vector<1x3xf32>
    %149 = vector.extract_strided_slice %144 {offsets = [8, 0], sizes = [1, 3], strides = [1, 1]} : vector<11x3xf32> to vector<1x3xf32>
    %150 = vector.extract_strided_slice %144 {offsets = [10, 0], sizes = [1, 3], strides = [1, 1]} : vector<11x3xf32> to vector<1x3xf32>
    %151 = tpu.concatenate %145, %146, %147, %148, %149, %150 in 1 : vector<1x3xf32>, vector<1x3xf32>, vector<1x3xf32>, vector<1x3xf32>, vector<1x3xf32>, vector<1x3xf32> -> vector<1x18xf32>
    %152 = tpu.concatenate %75, %151 in 0 : vector<1x18xf32>, vector<1x18xf32> -> vector<2x18xf32>
    %cst_21 = arith.constant 0.000000e+00 : f32
    %153 = vector.broadcast %cst_21 : f32 to vector<2x18xf32>
    %154 = arith.maximumf %152, %153 : vector<2x18xf32>
    %c0_22 = arith.constant 0 : index
    %c0_23 = arith.constant 0 : index
    %155 = vector.load %arg2[%c0_22, %c0_23] : memref<18x784xf32, #tpu.memory_space<vmem>>, vector<18x784xf32>
    %cst_24 = arith.constant dense<0.000000e+00> : vector<2x784xf32>
    %156 = tpu.matmul %154, %155, %cst_24 {dimension_numbers = #tpu.dot_dimension_numbers<[1], [0], [0], [1], [0, 0, 1, 1], [], []>, precision = #tpu.contract_precision<fp32>} : vector<2x18xf32>, vector<18x784xf32>, vector<2x784xf32> -> vector<2x784xf32>
    %c0_25 = arith.constant 0 : index
    %c0_26 = arith.constant 0 : index
    %157 = vector.load %arg3[%c0_25, %c0_26] : memref<2x784xf32, #tpu.memory_space<vmem>>, vector<2x784xf32>
    tpu.vector_store %arg3[%c0_25, %c0_26], %156 {strides = array<i32>} : memref<2x784xf32, #tpu.memory_space<vmem>>, vector<2x784xf32>,
    return
  }
}

</mosaic_0001>

<bundles_post_ra>
// kernel: tpu_custom_call.1
= control target key start
LH: loop header
LB: loop body
LE: loop exit
PB: predicated region body
PF: predicated region fallthrough
CT: control target
= control target key end

     0   :  { %8 = vsyncpa [#allocation3], 0  ;;  %s3521_s0 = inlined_call_operand.hbm [shape: f32[2,16,64], index: 0, kind: input, shape index: {}]   ;;  %s3522_s1 = inlined_call_operand.vmem [shape: f32[10], index: 1, kind: input, shape index: {}]   ;;  %s3523_s2 = inlined_call_operand.hbm [shape: f32[18,784], index: 2, kind: input, shape index: {}]   ;;  %s3524_s3 = inlined_call_operand.hbm [shape: f32[2,784], index: 3, kind: output, shape index: {}]  }
   0x1   :  { %9 = vsyncpa [#allocation5], 0 }
   0x2   :  { %10 = vsyncpa [#allocation8], 0 }
   0x3   :  { %11 = vsyncpa [#allocation4], 0  ;;  %s2922_s12 = smov [#allocation2]   ;;  %s30_s16 = sshll.u32 %s3522_s1, 4  ;;  %s31_s16 = int_to_ptr.vmem [resolvable:$true] %s30_s16 }
   0x4   :  { %s17_s13 = sshll.u32 %s2922_s12, 4  ;;  %s2836_s19 = scalar_lea.hbm %s3521_s0, 512  ;;  %s18_s13 = int_to_ptr.vmem [resolvable:$true] %s17_s13 }
   0x5   :  { %p2837_p0 = scmp.ne.s32.totalorder %s3521_s0, %s2836_s19  ;;  %p2840_p1 = scmp.lt.u32.totalorder %s2836_s19, %s3521_s0 }
   0x7   :  { %p2842_p2 = pnand %p2840_p1, %p2837_p0 }
   0x9   :  { %2845 = shalt.err (!%p2842_p2)
}
   0xa   :  { %s2846_s24 = scalar_lea.vmem %s18_s13, 512  ;;  %p2851_p4 = scmp.lt.s32.totalorder %s18_s13, %s18_s13 }
   0xb   :  { %p2847_p3 = scmp.ne.s32.totalorder %s18_s13, %s2846_s24  ;;  %p2852_p5 = scmp.lt.s32.totalorder %s2846_s24, %s2846_s24 }
   0xd   :  { %p2853_p6 = por %p2852_p5, %p2851_p4 }
   0xf   :  { %p2854_p7 = pnand %p2853_p6, %p2847_p3 }
  0x11   :  { %2857 = shalt.err (!%p2854_p7)
}
  0x12   :  { %s2923_s1 = smov 128   ;;  %s2924_s25 = smov 8  }
  0x13   :  { %23 = dma.hbm_to_vmem [thread:$0]  %s3521_s0, 512, %s18_s13, [#allocation3], %s2923_s1, %s2923_s1, %s2924_s25  }
  0x14   :  { %s2858_s28 = scalar_lea.vmem %s31_s16, 16  ;;  %p2863_p9 = scmp.lt.s32.totalorder %s31_s16, %s31_s16 }
  0x15   :  { %p2859_p8 = scmp.ne.s32.totalorder %s31_s16, %s2858_s28  ;;  %p2864_p10 = scmp.lt.s32.totalorder %s2858_s28, %s2858_s28 }
  0x17   :  { %p2865_p11 = por %p2864_p10, %p2863_p9 }
  0x19   :  { %p2866_p12 = pnand %p2865_p11, %p2859_p8 }
  0x1b   :  { %2869 = shalt.err (!%p2866_p12)
}
  0x1c   :  { %s2925_s29 = smov [#allocation6]   ;;  %s2926_s30 = smov [#allocation7]  }
  0x1d   :  { %33 = dma.vmem_to_smem %s31_s16, 16, %s2925_s29, [#allocation5]  }
  0x1e   :  { %s39_s4 = sshll.u32 %s2926_s30, 4  ;;  %s2870_s7 = scalar_lea.hbm %s3523_s2, 2688  ;;  %s40_s4 = int_to_ptr.vmem [resolvable:$true] %s39_s4 }
  0x1f   :  { %p2871_p13 = scmp.ne.s32.totalorder %s3523_s2, %s2870_s7  ;;  %p2874_p0 = scmp.lt.u32.totalorder %s2870_s7, %s3523_s2 }
  0x21   :  { %p2876_p1 = pnand %p2874_p0, %p2871_p13 }
  0x23   :  { %2879 = shalt.err (!%p2876_p1)
}
  0x24   :  { %s2880_s11 = scalar_lea.vmem %s40_s4, 2688  ;;  %p2885_p3 = scmp.lt.s32.totalorder %s40_s4, %s40_s4 }
  0x25   :  { %p2881_p2 = scmp.ne.s32.totalorder %s40_s4, %s2880_s11  ;;  %p2886_p4 = scmp.lt.s32.totalorder %s2880_s11, %s2880_s11 }
  0x27   :  { %p2887_p5 = por %p2886_p4, %p2885_p3 }
  0x29   :  { %p2888_p6 = pnand %p2887_p5, %p2881_p2 }
  0x2b   :  { %2891 = shalt.err (!%p2888_p6)
}
  0x2c   :  { %s2927_s12 = smov 896   ;;  %s2928_s13 = smov 56  }
  0x2d   :  { %45 = dma.hbm_to_vmem [thread:$0]  %s3523_s2, 2688, %s40_s4, [#allocation8], %s2927_s12, %s2927_s12, %s2928_s13  }
  0x2e   :  { %2914 = dma.done.wait [#allocation3], 512  }
  0x2f   :  { %2915 = vsyncadd [#allocation3], 4294966784 }
  0x30   :  { %2916 = dma.done.wait [#allocation5], 16  }
  0x31   :  { %2917 = vsyncadd [#allocation5], 4294967280 }
  0x32   :  { %2918 = dma.done.wait [#allocation8], 2688  }
  0x33   :  { %2919 = vsyncadd [#allocation8], 4294964608 }
  0x34   :  { %55 = sfence }
  0x35   :  { %s2601_s16 = sld [smem:[#allocation6 + $0x1]]  ;;  %s2602_s17 = sld [smem:[#allocation6 + $0x2]]  ;;  %v2988_v0 = vld [vmem:[#allocation2 + $0x10] sm:$0xff]  ;;  %v2990_v1 = vld [vmem:[#allocation2] sm:$0xff]  ;;  %v2992_v3 = vld [vmem:[#allocation2 + $0x18] sm:$0xff]  ;;  %vm100_vm0 = vcmask 1046528  }
  0x36   :  { %s2604_s18 = sld [smem:[#allocation6 + $0x4]]  ;;  %v2994_v4 = vld [vmem:[#allocation2 + $0x8] sm:$0xff]  ;;  %s2605_s2 = sld [smem:[#allocation6 + $0x5]]  ;;  %vm148_vm1 = vcmask 1045504   ;;  %vm206_vm2 = vcmask 1044480   ;;  %vm226_vm3 = vcmask 231624  }
  0x37   :  { %s2929_s19 = smov 127   ;;  %s2603_s20 = sld [smem:[#allocation6 + $0x3]]  ;;  %vm218_vm4 = vcmask 26624   ;;  %vm234_vm5 = vcmask 436624   ;;  %vm222_vm6 = vcmask 236744   ;;  %vm214_vm7 = vcmask 31744  }
  0x38   :  { %s2606_s21 = sld [smem:[#allocation6 + $0x6]]  ;;  %s2930_s22 = smov 126   ;;  %vm230_vm8 = vcmask 441744   ;;  %vm238_vm9 = vcmask 7168   ;;  %vm241_vm10 = vcmask 15360   ;;  %vm490_vm11 = vcmask 1041408  }
  0x39   :  { %s2607_s23 = sld [smem:[#allocation6 + $0x7]]  ;;  %s2608_s24 = sld [smem:[#allocation6 + $0x8]]  ;;  %vm265_vm12 = vcmask 23552   ;;  %vm267_vm13 = vcmask 48128   ;;  %vm269_vm14 = vcmask 72704   ;;  %vm271_vm15 = vcmask 97280  }
  0x3a   :  { %s60_s1 = sld [smem:[#allocation6]]  ;;  %s2600_s25 = sld [smem:[#allocation6 + $0x9]] }
  0x3b   :  { %v67_v2 = vstv %s2601_s16  ;;  %v81_v9 = vstv %s2602_s17  ;;  %s2931_s26 = smov 12   ;;  %s2932_s27 = smov 15  }
  0x3c   :  { %v282_v5 = vmul.f32 %v2988_v0, %v67_v2  ;;  %v68_v6 = vmul.f32 %v67_v2, %v2990_v1  ;;  %v283_v7 = vmul.f32 %v2992_v3, %v67_v2  ;;  %v69_v8 = vmul.f32 %v67_v2, %v2994_v4  ;;  %s2933_s28 = smov 3   ;;  %s2934_s29 = smov 6  }
  0x3d   :  { %v109_v10 = vstv %s2604_s18  ;;  %v294_v11 = vmul.f32 %v2988_v0, %v81_v9  ;;  %v295_v12 = vmul.f32 %v2992_v3, %v81_v9  ;;  %v126_v15 = vstv %s2605_s2  ;;  %s2935_s30 = smov 9   ;;  %s2940_s4 = smov [#allocation9]  }
  0x3e   :  { %286 = vrot.lane.b32.xlu0 %v282_v5, %s2929_s19  ;;  %72 = vrot.lane.b32.xlu1 %v68_v6, %s2929_s19  ;;  %v317_v13 = vmul.f32 %v2988_v0, %v109_v10  ;;  %v318_v14 = vmul.f32 %v2992_v3, %v109_v10  ;;  %v82_v16 = vmul.f32 %v81_v9, %v2990_v1  ;;  %v95_v25 = vstv %s2603_s20  ;;  %s2589_s5 = sshll.u32 %s2940_s4, 4  ;;  %s2590_s5 = int_to_ptr.vmem [resolvable:$true] %s2589_s5 }
  0x3f   :  { %v83_v17 = vmul.f32 %v81_v9, %v2994_v4  ;;  %v110_v20 = vmul.f32 %v109_v10, %v2990_v1  ;;  %v111_v21 = vmul.f32 %v109_v10, %v2994_v4  ;;  %v332_v22 = vmul.f32 %v2988_v0, %v126_v15  ;;  %s2892_s6 = scalar_lea.vmem %s2590_s5, 224  ;;  %p2897_p8 = scmp.lt.s32.totalorder %s2590_s5, %s2590_s5 }
  0x40   :  { %v321_v18 = vrot.slane %v317_v13, 1  ;;  %v322_v19 = vrot.slane %v318_v14, 1  ;;  %v333_v23 = vmul.f32 %v2992_v3, %v126_v15  ;;  %v127_v24 = vmul.f32 %v126_v15, %v2990_v1  ;;  %p2893_p7 = scmp.ne.s32.totalorder %s2590_s5, %s2892_s6  ;;  %p2898_p9 = scmp.lt.s32.totalorder %s2892_s6, %s2892_s6 }
  0x41   :  { %v114_v27 = vrot.slane %v110_v20, 1  ;;  %v115_v28 = vrot.slane %v111_v21, 1  ;;  %v306_v29 = vmul.f32 %v2988_v0, %v95_v25  ;;  %v336_v30 = vrot.slane %v332_v22, 1 }
  0x42   :  { %288 = vrot.lane.b32.xlu0 %v283_v7, %s2929_s19  ;;  %74 = vrot.lane.b32.xlu1 %v69_v8, %s2929_s19  ;;  %v323_v26 = vsel %vm100_vm0, %v321_v18, %v322_v19  ;;  %v128_v31 = vmul.f32 %v126_v15, %v2994_v4  ;;  %v3023_v32 = vmul.f32 %v2992_v3, %v95_v25  ;;  %v337_v34 = vrot.slane %v333_v23, 1  ;;  %p2899_p10 = por %p2898_p9, %p2897_p8 }
  0x43   :  { %v96_v33 = vmul.f32 %v95_v25, %v2990_v1  ;;  %v310_v35 = vrot.slane %v306_v29, 1  ;;  %v3027_v36 = vmul.f32 %v95_v25, %v2994_v4  ;;  %v143_v37 = vstv %s2606_s21 }
  0x44   :  { %v311_v38 = vrot.slane %v3023_v32, 1  ;;  %v347_v40 = vmul.f32 %v2988_v0, %v143_v37  ;;  %v3034_v41 = vmul.f32 %v2992_v3, %v143_v37  ;;  %v116_v42 = vsel %vm100_vm0, %v114_v27, %v115_v28  ;;  %p2900_p11 = pnand %p2899_p10, %p2893_p7 }
  0x45   :  { %v101_v39 = vrot.slane %v96_v33, 1  ;;  %v102_v43 = vrot.slane %v3027_v36, 1  ;;  %v144_v44 = vmul.f32 %v143_v37, %v2990_v1  ;;  %v3040_v45 = vmul.f32 %v143_v37, %v2994_v4 }
  0x46   :  { %298 = vrot.lane.b32.xlu0 %v294_v11, %s2930_s22  ;;  %300 = vrot.lane.b32.xlu1 %v295_v12, %s2930_s22  ;;  %v157_v46 = vstv %s2607_s23  ;;  %v3045_v47 = vsel %vm100_vm0, %v310_v35, %v311_v38  ;;  %v351_v48 = vrot.slane %v347_v40, 2  ;;  %v352_v49 = vrot.slane %v3034_v41, 2 }
  0x47   :  { %v3051_v50 = vsel %vm100_vm0, %v101_v39, %v102_v43  ;;  %v149_v51 = vrot.slane %v144_v44, 2  ;;  %v150_v52 = vrot.slane %v3040_v45, 2  ;;  %v131_v53 = vrot.slane %v127_v24, 1 }
  0x48   :  { %v132_v54 = vrot.slane %v128_v31, 1  ;;  %v3059_v55 = vsel %vm148_vm1, %v351_v48, %v352_v49  ;;  %v338_v56 = vsel %vm100_vm0, %v336_v30, %v337_v34  ;;  %v358_v57 = vmul.f32 %v2988_v0, %v157_v46 }
  0x49   :  { %v359_v58 = vmul.f32 %v2992_v3, %v157_v46  ;;  %v3067_v59 = vsel %vm148_vm1, %v149_v51, %v150_v52  ;;  %v158_v60 = vmul.f32 %v157_v46, %v2990_v1  ;;  %v159_v2 = vmul.f32 %v157_v46, %v2994_v4 }
  0x4a   :  { %86 = vrot.lane.b32.xlu0 %v82_v16, %s2930_s22  ;;  %88 = vrot.lane.b32.xlu1 %v83_v17, %s2930_s22  ;;  %v133_v61 = vsel %vm100_vm0, %v131_v53, %v132_v54  ;;  %v362_v62 = vrot.slane %v358_v57, 2  ;;  %v174_v5 = vstv %s2608_s24  ;;  %v61_v20 = vstv %s60_s1 }
  0x4b   :  { %v363_v63 = vrot.slane %v359_v58, 2  ;;  %v162_v6 = vrot.slane %v158_v60, 2  ;;  %v163_v8 = vrot.slane %v159_v2, 2  ;;  %v373_v9 = vmul.f32 %v2988_v0, %v174_v5 }
  0x4c   :  { %v374_v10 = vmul.f32 %v2992_v3, %v174_v5  ;;  %v175_v11 = vmul.f32 %v174_v5, %v2990_v1  ;;  %v176_v15 = vmul.f32 %v174_v5, %v2994_v4  ;;  %v278_v21 = vmul.f32 %v2988_v0, %v61_v20 }
  0x4d   :  { %v364_v7 = vsel %vm148_vm1, %v362_v62, %v363_v63  ;;  %v164_v12 = vsel %vm148_vm1, %v162_v6, %v163_v8  ;;  %v377_v13 = vrot.slane %v373_v9, 2  ;;  %v59_v23 = vstv %s2600_s25 }
  0x4e   :  { %324 = vrot.lane.b32.xlu0 %v323_v26, %s2929_s19  ;;  %326 = vrot.lane.b32.xlu1 %v322_v19, %s2929_s19  ;;  %v378_v14 = vrot.slane %v374_v10, 2  ;;  %v179_v17 = vrot.slane %v175_v11, 2  ;;  %v180_v18 = vrot.slane %v176_v15, 2  ;;  %v280_v25 = vadd.f32 %v278_v21, %v59_v23 }
  0x4f   :  { %v62_v26 = vmul.f32 %v61_v20, %v2990_v1  ;;  %v279_v0 = vmul.f32 %v2992_v3, %v61_v20  ;;  %v63_v51 = vmul.f32 %v61_v20, %v2994_v4 }
  0x50   :  { %v379_v16 = vsel %vm148_vm1, %v377_v13, %v378_v14  ;;  %v181_v19 = vsel %vm148_vm1, %v179_v17, %v180_v18 }
  0x51   :  { %v64_v30 = vadd.f32 %v62_v26, %v59_v23  ;;  %v281_v1 = vadd.f32 %v279_v0, %v59_v23  ;;  %v65_v57 = vadd.f32 %v63_v51, %v59_v23 }
  0x52   :  { %117 = vrot.lane.b32.xlu0 %v116_v42, %s2929_s19  ;;  %119 = vrot.lane.b32.xlu1 %v115_v28, %s2929_s19 }
  0x56   :  { %339 = vrot.lane.b32.xlu0 %v338_v56, %s2930_s22  ;;  %341 = vrot.lane.b32.xlu1 %v337_v34, %s2930_s22 }
  0x5a   :  { %134 = vrot.lane.b32.xlu0 %v133_v61, %s2930_s22  ;;  %136 = vrot.lane.b32.xlu1 %v132_v54, %s2930_s22 }
  0x5e   :  { %365 = vrot.lane.b32.xlu0 %v364_v7, %s2929_s19  ;;  %367 = vrot.lane.b32.xlu1 %v363_v63, %s2929_s19 }
  0x62   :  { %165 = vrot.lane.b32.xlu0 %v164_v12, %s2929_s19  ;;  %167 = vrot.lane.b32.xlu1 %v163_v8, %s2929_s19 }
  0x66   :  { %380 = vrot.lane.b32.xlu0 %v379_v16, %s2930_s22  ;;  %382 = vrot.lane.b32.xlu1 %v378_v14, %s2930_s22 }
  0x6a   :  { %182 = vrot.lane.b32.xlu0 %v181_v19, %s2930_s22  ;;  %184 = vrot.lane.b32.xlu1 %v180_v18, %s2930_s22 }
  0xb0   :  { %v287_v22 = vpop.permute.xlu0 %286  ;;  %v73_v24 = vpop.permute.xlu1 %72 }
  0xb1   :  { %v292_v29 = vadd.f32 %v287_v22, %v280_v25  ;;  %v78_v35 = vadd.f32 %v73_v24, %v64_v30 }
  0xb4   :  { %v289_v27 = vpop.permute.xlu0 %288  ;;  %v75_v28 = vpop.permute.xlu1 %74 }
  0xb5   :  { %v293_v56 = vadd.f32 %v289_v27, %v281_v1  ;;  %v79_v63 = vadd.f32 %v75_v28, %v65_v57 }
  0xb8   :  { %v299_v31 = vpop.permute.xlu0 %298  ;;  %v301_v33 = vpop.permute.xlu1 %300 }
  0xb9   :  { %v304_v34 = vadd.f32 %v299_v31, %v292_v29 }
  0xbb   :  { %v315_v37 = vadd.f32 %v3045_v47, %v304_v34  ;;  %v305_v47 = vadd.f32 %v301_v33, %v293_v56 }
  0xbc   :  { %v87_v39 = vpop.permute.xlu0 %86  ;;  %v89_v40 = vpop.permute.xlu1 %88 }
  0xbd   :  { %v92_v42 = vadd.f32 %v87_v39, %v78_v35  ;;  %v93_v5 = vadd.f32 %v89_v40, %v79_v63  ;;  %v316_v7 = vadd.f32 %v311_v38, %v305_v47 }
  0xbf   :  { %v106_v44 = vadd.f32 %v3051_v50, %v92_v42  ;;  %v107_v10 = vadd.f32 %v102_v43, %v93_v5 }
  0xc0   :  { %v325_v46 = vpop.permute.xlu0 %324  ;;  %v327_v48 = vpop.permute.xlu1 %326 }
  0xc1   :  { %v330_v58 = vadd.f32 %v325_v46, %v315_v37  ;;  %v331_v8 = vadd.f32 %v327_v48, %v316_v7 }
  0xc4   :  { %v118_v53 = vpop.permute.xlu0 %117  ;;  %v120_v54 = vpop.permute.xlu1 %119 }
  0xc5   :  { %v123_v2 = vadd.f32 %v118_v53, %v106_v44  ;;  %v124_v14 = vadd.f32 %v120_v54, %v107_v10 }
  0xc8   :  { %v340_v60 = vpop.permute.xlu0 %339  ;;  %v342_v61 = vpop.permute.xlu1 %341 }
  0xc9   :  { %v345_v62 = vadd.f32 %v340_v60, %v330_v58  ;;  %v346_v13 = vadd.f32 %v342_v61, %v331_v8 }
  0xcb   :  { %v356_v3 = vadd.f32 %v3059_v55, %v345_v62  ;;  %v357_v17 = vadd.f32 %v352_v49, %v346_v13 }
  0xcc   :  { %v135_v50 = vpop.permute.xlu0 %134  ;;  %v137_v6 = vpop.permute.xlu1 %136 }
  0xcd   :  { %v140_v4 = vadd.f32 %v135_v50, %v123_v2  ;;  %v141_v15 = vadd.f32 %v137_v6, %v124_v14 }
  0xcf   :  { %v154_v9 = vadd.f32 %v3067_v59, %v140_v4  ;;  %v155_v38 = vadd.f32 %v150_v52, %v141_v15 }
  0xd0   :  { %v366_v11 = vpop.permute.xlu0 %365  ;;  %v368_v12 = vpop.permute.xlu1 %367 }
  0xd1   :  { %v371_v18 = vadd.f32 %v366_v11, %v356_v3  ;;  %v372_v32 = vadd.f32 %v368_v12, %v357_v17 }
  0xd4   :  { %v166_v16 = vpop.permute.xlu0 %165  ;;  %v168_v55 = vpop.permute.xlu1 %167 }
  0xd5   :  { %v171_v43 = vadd.f32 %v166_v16, %v154_v9  ;;  %v172_v21 = vadd.f32 %v168_v55, %v155_v38 }
  0xd8   :  { %v381_v19 = vpop.permute.xlu0 %380  ;;  %v383_v59 = vpop.permute.xlu1 %382 }
  0xd9   :  { %v386_v20 = vadd.f32 %v381_v19, %v371_v18  ;;  %v387_v36 = vadd.f32 %v383_v59, %v372_v32 }
  0xdb   :  { %v390_v22 = vrot.slane %v386_v20, 1  ;;  %v397_v23 = vrot.slane %v386_v20, 2  ;;  %v404_v24 = vrot.slane %v386_v20, 3  ;;  %v391_v25 = vrot.slane %v387_v36, 1 }
  0xdc   :  { %v398_v26 = vrot.slane %v387_v36, 2  ;;  %v183_v27 = vpop.permute.xlu0 %182  ;;  %v185_v41 = vpop.permute.xlu1 %184  ;;  %v405_v49 = vrot.slane %v387_v36, 3 }
  0xdd   :  { %v396_v28 = vmax.f32 %v387_v36, %v391_v25  ;;  %v188_v29 = vadd.f32 %v183_v27, %v171_v43  ;;  %v189_v30 = vadd.f32 %v185_v41, %v172_v21  ;;  %v392_v45 = vsel %vm100_vm0, %v390_v22, %v391_v25 }
  0xde   :  { %v395_v52 = vmax.f32 %v386_v20, %v392_v45  ;;  %v399_v31 = vsel %vm148_vm1, %v397_v23, %v398_v26  ;;  %v406_v33 = vsel %vm206_vm2, %v404_v24, %v405_v49  ;;  %v468_v45 = vld [vmem:[#allocation7 + $0x18] sm:$0xff] }
  0xdf   :  { %v192_v34 = vrot.slane %v188_v29, 1  ;;  %v199_v35 = vrot.slane %v188_v29, 2  ;;  %v207_v37 = vrot.slane %v188_v29, 3  ;;  %v193_v39 = vrot.slane %v189_v30, 1 }
  0xe0   :  { %v200_v40 = vrot.slane %v189_v30, 2  ;;  %v403_v0 = vmax.f32 %v396_v28, %v398_v26  ;;  %v208_v42 = vrot.slane %v189_v30, 3  ;;  %v402_v44 = vmax.f32 %v395_v52, %v399_v31 }
  0xe1   :  { %v198_v46 = vmax.f32 %v189_v30, %v193_v39  ;;  %v194_v48 = vsel %vm100_vm0, %v192_v34, %v193_v39  ;;  %v473_v30 = vld [vmem:[#allocation7 + $0x40] sm:$0xff]  ;;  %v475_v34 = vld [vmem:[#allocation7 + $0x50] sm:$0xff]  ;;  %vm273_vm0 = vcmask 121856  }
  0xe2   :  { %v410_v1 = vmax.f32 %v403_v0, %v405_v49  ;;  %v409_v51 = vmax.f32 %v402_v44, %v406_v33  ;;  %v197_v53 = vmax.f32 %v188_v29, %v194_v48  ;;  %v201_v54 = vsel %vm148_vm1, %v199_v35, %v200_v40  ;;  %v466_v29 = vld [vmem:[#allocation7 + $0x8] sm:$0xff] }
  0xe3   :  { %v205_v56 = vmax.f32 %v198_v46, %v200_v40  ;;  %v209_v57 = vsel %vm206_vm2, %v207_v37, %v208_v42  ;;  %v512_v31 = vand.u32 4294901760, %v466_v29  ;;  %v516_v33 = vand.u32 4294901760, %v473_v30  ;;  %v465_v37 = vld [vmem:[#allocation7] sm:$0xff]  ;;  %v472_v40 = vld [vmem:[#allocation7 + $0x38] sm:$0xff]  ;;  %v474_v44 = vld [vmem:[#allocation7 + $0x48] sm:$0xff] }
  0xe4   :  { %v420_v58 = vsel %vm226_vm3, %v410_v1, -inf  ;;  %v414_v60 = vsel %vm218_vm4, %v410_v1, -inf  ;;  %v204_v47 = vmax.f32 %v197_v53, %v201_v54  ;;  %v426_v2 = vsel %vm234_vm5, %v410_v1, -inf  ;;  %v480_v53 = vld [vmem:[#allocation7 + $0x78] sm:$0x3] }
  0xe5   :  { %421 = vmax.xlane.f32.xlu0 %v420_v58  ;;  %415 = vmax.xlane.f32.xlu1 %v414_v60  ;;  %v213_v61 = vmax.f32 %v205_v56, %v208_v42  ;;  %v417_v3 = vsel %vm222_vm6, %v409_v51, -inf  ;;  %v411_v5 = vsel %vm214_vm7, %v409_v51, -inf  ;;  %v423_v50 = vsel %vm230_vm8, %v409_v51, -inf  ;;  %v467_v42 = vld [vmem:[#allocation7 + $0x10] sm:$0xff]  ;;  %v482_v54 = vld [vmem:[#allocation7 + $0x88] sm:$0x3] }
  0xe6   :  { %v212_v63 = vmax.f32 %v204_v47, %v209_v57  ;;  %v1029_v35 = vand.u32 4294901760, %v468_v45  ;;  %v1033_v39 = vand.u32 4294901760, %v475_v34  ;;  %v514_v0 = vand.u32 4294901760, %v465_v37 }
  0xe7   :  { %v219_v62 = vsel %vm218_vm4, %v213_v61, -inf  ;;  %v227_v7 = vsel %vm226_vm3, %v213_v61, -inf  ;;  %v235_v9 = vsel %vm234_vm5, %v213_v61, -inf  ;;  %v3138_v46 = vpack.c.bf16 %v516_v33, %v512_v31  ;;  %v479_v61 = vld [vmem:[#allocation7 + $0x70] sm:$0x3] }
  0xe8   :  { %v223_v6 = vsel %vm222_vm6, %v212_v63, -inf  ;;  %v215_v4 = vsel %vm214_vm7, %v212_v63, -inf  ;;  %v231_v8 = vsel %vm230_vm8, %v212_v63, -inf  ;;  %v3140_v48 = vsub.f32 %v466_v29, %v512_v31 }
  0xe9   :  { %427 = vmax.xlane.f32.xlu1 %v426_v2  ;;  %220 = vmax.xlane.f32.xlu0 %v219_v62  ;;  %v3142_v1 = vsub.f32 %v473_v30, %v516_v33  ;;  %v518_v51 = vand.u32 4294901760, %v472_v40  ;;  %v3144_v56 = vpack.c.bf16 %v1033_v39, %v1029_v35  ;;  %v3146_v57 = vsub.f32 %v468_v45, %v1029_v35 }
  0xea   :  { %v3148_v58 = vsub.f32 %v475_v34, %v1033_v39  ;;  %v3150_v60 = vsub.f32 %v465_v37, %v514_v0  ;;  %2688 = vmatprep.subr.bf16.mxu0 %v3138_v46  ;;  %v1031_v63 = vand.u32 4294901760, %v467_v42  ;;  %v1035_v2 = vand.u32 4294901760, %v474_v44 }
  0xeb   :  { %v3153_v47 = vpack.c.bf16 %v518_v51, %v514_v0  ;;  %v3155_v62 = vsub.f32 %v472_v40, %v518_v51  ;;  %2712 = vmatprep.subr.bf16.mxu1 %v3144_v56  ;;  %v2695_v35 = vpack.c.bf16 %v3142_v1, %v3140_v48  ;;  %vm462_vm1 = vcmask 1040384  }
  0xec   :  { %v2719_v40 = vpack.c.bf16 %v3148_v58, %v3146_v57  ;;  %vm486_vm2 = vcmask 146432   ;;  %vm2938_vm3 = vmmov 0   ;;  %vm2578_vm4 = vcmask 1043458  }
  0xed   :  { %418 = vmax.xlane.f32.xlu1 %v417_v3  ;;  %412 = vmax.xlane.f32.xlu0 %v411_v5  ;;  %v481_v3 = vld [vmem:[#allocation7 + $0x80] sm:$0x3]  ;;  %v3159_v5 = vsel %vm490_vm11, %v480_v53, 0  ;;  %v2697_v37 = vpack.c.bf16 %v3155_v62, %v3150_v60  ;;  %vm2579_vm5 = vmor %vm2578_vm4, %vm490_vm11  ;;  %vm2580_vm6 = vcmask 128004  }
  0xee   :  { %2690 = vmatpush1.bf16.msra.mxu0 %v3153_v47  ;;  %vm2581_vm7 = vmor %vm2580_vm6, %vm2579_vm5 }
  0xf1   :  { %424 = vmax.xlane.f32.xlu0 %v423_v50  ;;  %224 = vmax.xlane.f32.xlu1 %v223_v6  ;;  %v3162_v50 = vsel %vm490_vm11, %v482_v54, 0  ;;  %v3165_v6 = vsel %vm490_vm11, %v479_v61, 0 }
  0xf5   :  { %228 = vmax.xlane.f32.xlu1 %v227_v7  ;;  %216 = vmax.xlane.f32.xlu0 %v215_v4  ;;  %v3169_v7 = vpack.c.bf16 %v1035_v2, %v1031_v63  ;;  %v3171_v4 = vsub.f32 %v467_v42, %v1031_v63 }
  0xf7   :  { %2714 = vmatpush1.bf16.msra.mxu1 %v3169_v7 }
  0xf9   :  { %232 = vmax.xlane.f32.xlu0 %v231_v8  ;;  %v3173_v8 = vsub.f32 %v474_v44, %v1035_v2 }
  0xfb   :  { %v2721_v0 = vpack.c.bf16 %v3173_v8, %v3171_v4 }
  0xfd   :  { %236 = vmax.xlane.f32.xlu0 %v235_v9  ;;  %v3176_v9 = vand.u32 4294901760, %v3159_v5 }
  0xff   :  { %521 = vmatprep.subr.mxu0 %v3176_v9 }
 0x172   :  { %v422_v10 = vpop.xlane.xlu0 %421  ;;  %v416_v11 = vpop.xlane.xlu1 %415 }
 0x173   :  { %v430_v12 = vsel %vm238_vm9, %v416_v11, %v422_v10  ;;  %v3180_v10 = vand.u32 4294901760, %v3162_v50  ;;  %v3183_v11 = vand.u32 4294901760, %v3165_v6 }
 0x175   :  { %1038 = vmatprep.subr.mxu1 %v3180_v10  ;;  %523 = vmatpush1.msra.mxu0 %v3183_v11 }
 0x176   :  { %v221_v13 = vpop.xlane.xlu0 %220  ;;  %v428_v14 = vpop.xlane.xlu1 %427 }
 0x177   :  { %v432_v15 = vsel %vm241_vm10, %v430_v12, %v428_v14  ;;  %v2936_v12 = vmov 0.0   ;;  %v596_v14 = vand.u32 4294901760, %v3140_v48 }
 0x178   :  { %447 = vrot.lane.b32.xlu1 %v432_v15, %s2931_s26  ;;  %v450_v16 = vrot.slane %v432_v15, 2  ;;  %582 = vmatprep.mubr.f32.mxu0 %v2936_v12 }
 0x179   :  { %1099 = vmatprep.mubr.f32.mxu1 %v2936_v12 }
 0x17a   :  { %v413_v55 = vpop.xlane.xlu0 %412  ;;  %v419_v17 = vpop.xlane.xlu1 %418 }
 0x17b   :  { %v429_v18 = vsel %vm238_vm9, %v413_v55, %v419_v17  ;;  %v602_v55 = vand.u32 4294901760, %v3150_v60  ;;  %v614_v17 = vand.u32 4294901760, %v3155_v62 }
 0x17c   :  { %451 = vrot.lane.b32.xlu1 %v450_v16, %s2932_s27  ;;  %v608_v16 = vand.u32 4294901760, %v3142_v1 }
 0x17d   :  { %v3226_v44 = vpack.c.bf16 %v614_v17, %v602_v55 }
 0x17e   :  { %v425_v32 = vpop.xlane.xlu0 %424  ;;  %v225_v20 = vpop.xlane.xlu1 %224  ;;  %v3224_v42 = vpack.c.bf16 %v608_v16, %v596_v14 }
 0x17f   :  { %v3124_v38 = vsel %vm241_vm10, %v429_v18, %v425_v32  ;;  %v597_v18 = vsub.f32 %v3140_v48, %v596_v14  ;;  %v1113_v32 = vand.u32 4294901760, %v3146_v57  ;;  %v470_v48 = vld [vmem:[#allocation7 + $0x28] sm:$0xff] }
 0x180   :  { %v434_v19 = vrot.slane %v3124_v38, 2  ;;  %v438_v59 = vrot.slane %v3124_v38, 4  ;;  %v442_v49 = vrot.slane %v3124_v38, 6 }
 0x182   :  { %435 = vrot.lane.b32.xlu1 %v434_v19, %s2933_s28  ;;  %439 = vrot.lane.b32.xlu0 %v438_v59, %s2934_s29  ;;  %v217_v36 = vpop.xlane.xlu0 %216  ;;  %v229_v22 = vpop.xlane.xlu1 %228  ;;  %v1125_v19 = vand.u32 4294901760, %v3148_v58  ;;  %v609_v59 = vsub.f32 %v3142_v1, %v608_v16  ;;  %v477_v1 = vld [vmem:[#allocation7 + $0x60] sm:$0xff] }
 0x183   :  { %v239_v43 = vsel %vm238_vm9, %v217_v36, %v225_v20  ;;  %v240_v26 = vsel %vm238_vm9, %v221_v13, %v229_v22  ;;  %v3187_v13 = vsel %vm490_vm11, %v481_v3, 0  ;;  %v603_v20 = vsub.f32 %v3150_v60, %v602_v55 }
 0x184   :  { %v3193_v15 = vand.u32 4294901760, %v3187_v13  ;;  %v615_v36 = vsub.f32 %v3155_v62, %v614_v17  ;;  %v1126_v22 = vsub.f32 %v3148_v58, %v1125_v19  ;;  %v3228_v51 = vpack.c.bf16 %v1125_v19, %v1113_v32  ;;  %v476_v58 = vld [vmem:[#allocation7 + $0x58] sm:$0xff] }
 0x185   :  { %v1546_v60 = vand.u32 4294901760, %v470_v48  ;;  %v1550_v62 = vand.u32 4294901760, %v477_v1 }
 0x186   :  { %v233_v21 = vpop.xlane.xlu0 %232  ;;  %1040 = vmatpush1.msra.mxu1 %v3193_v15 }
 0x187   :  { %v3130_v23 = vsel %vm241_vm10, %v239_v43, %v233_v21  ;;  %v598_v43 = vand.u32 4294901760, %v597_v18  ;;  %v1114_v21 = vsub.f32 %v3146_v57, %v1113_v32  ;;  %v3313_v57 = vld [vmem:[#allocation7 + $0x20] sm:$0xff] }
 0x188   :  { %v249_v24 = vrot.slane %v3130_v23, 4  ;;  %v245_v25 = vrot.slane %v3130_v23, 2  ;;  %v253_v41 = vrot.slane %v3130_v23, 6 }
 0x18a   :  { %250 = vrot.lane.b32.xlu0 %v249_v24, %s2934_s29  ;;  %246 = vrot.lane.b32.xlu1 %v245_v25, %s2933_s28  ;;  %v237_v27 = vpop.xlane.xlu0 %236  ;;  %v1119_v24 = vand.u32 4294901760, %v3171_v4  ;;  %v610_v25 = vand.u32 4294901760, %v609_v59 }
 0x18b   :  { %v243_v28 = vsel %vm241_vm10, %v240_v26, %v237_v27  ;;  %v604_v26 = vand.u32 4294901760, %v603_v20  ;;  %v616_v27 = vand.u32 4294901760, %v615_v36 }
 0x18c   :  { %v261_v52 = vrot.slane %v243_v28, 2  ;;  %v1120_v29 = vsub.f32 %v3171_v4, %v1119_v24  ;;  %v2691_v30 = vpack.c.bf16 %v610_v25, %v598_v43  ;;  %v471_v4 = vld [vmem:[#allocation7 + $0x30] sm:$0xff] }
 0x18d   :  { %v3213_v45 = vpack.c.bf16 %v616_v27, %v604_v26  ;;  %v3236_v27 = vsub.f32 %v3159_v5, %v3176_v9 }
 0x18e   :  { %254 = vrot.lane.b32.xlu0 %v253_v41, %s2935_s30  ;;  %443 = vrot.lane.b32.xlu1 %v442_v49, %s2935_s30  ;;  %v1131_v41 = vand.u32 4294901760, %v3173_v8  ;;  %v1115_v49 = vand.u32 4294901760, %v1114_v21  ;;  %v1121_v33 = vand.u32 4294901760, %v1120_v29  ;;  %v3248_v29 = vsub.f32 %v3187_v13, %v3193_v15 }
 0x18f   :  { %2692 = vmatprep.subr.bf16.mxu0 %v2691_v30 }
 0x190   :  { %v3230_v53 = vpack.c.bf16 %v1131_v41, %v1119_v24 }
 0x192   :  { %258 = vrot.lane.b32.xlu0 %v243_v28, %s2931_s26  ;;  %262 = vrot.lane.b32.xlu1 %v261_v52, %s2932_s27  ;;  %v1127_v28 = vand.u32 4294901760, %v1126_v22  ;;  %v1132_v52 = vsub.f32 %v3173_v8, %v1131_v41  ;;  %v478_v8 = vld [vmem:[#allocation7 + $0x68] sm:$0xff] }
 0x194   :  { %v2715_v31 = vpack.c.bf16 %v1127_v28, %v1115_v49  ;;  %v1133_v34 = vand.u32 4294901760, %v1132_v52  ;;  %v3244_v28 = vsub.f32 %v3165_v6, %v3183_v11  ;;  %v620_v52 = vand.u32 4294901760, %v3236_v27 }
 0x196   :  { %2716 = vmatprep.subr.bf16.mxu1 %v2715_v31  ;;  %v2717_v39 = vpack.c.bf16 %v1133_v34, %v1121_v33  ;;  %v1143_v33 = vand.u32 4294901760, %v3248_v29  ;;  %v621_v13 = vsub.f32 %v3236_v27, %v620_v52 }
 0x1ea   :  { %v448_v54 = vpop.permute.xlu1 %447 }
 0x1ee   :  { %v452_v61 = vpop.permute.xlu1 %451 }
 0x1f4   :  { %v436_v63 = vpop.permute.xlu1 %435  ;;  %v440_v2 = vpop.permute.xlu0 %439 }
 0x1f5   :  { %v454_v59 = vsel %vm265_vm12, %v3124_v38, %v436_v63  ;;  %v1144_v63 = vsub.f32 %v3248_v29, %v1143_v33 }
 0x1f6   :  { %v455_v14 = vsel %vm267_vm13, %v454_v59, %v440_v2 }
 0x1fc   :  { %v247_v3 = vpop.permute.xlu1 %246  ;;  %v251_v18 = vpop.permute.xlu0 %250 }
 0x1fd   :  { %v266_v16 = vsel %vm265_vm12, %v3130_v23, %v247_v3  ;;  %v3240_v23 = vsub.f32 %v3162_v50, %v3180_v10  ;;  %v626_v50 = vand.u32 4294901760, %v3244_v28  ;;  %v622_v3 = vand.u32 4294901760, %v621_v13 }
 0x1fe   :  { %v268_v20 = vsel %vm267_vm13, %v266_v16, %v251_v18  ;;  %v3331_v16 = vsub.f32 %v477_v1, %v1550_v62 }
 0x1ff   :  { %v1137_v5 = vand.u32 4294901760, %v3240_v23 }
 0x200   :  { %v444_v55 = vpop.permute.xlu1 %443  ;;  %v255_v17 = vpop.permute.xlu0 %254 }
 0x201   :  { %v456_v32 = vsel %vm269_vm14, %v455_v14, %v444_v55  ;;  %v270_v21 = vsel %vm269_vm14, %v268_v20, %v255_v17  ;;  %v1138_v34 = vsub.f32 %v3240_v23, %v1137_v5  ;;  %v1145_v14 = vand.u32 4294901760, %v1144_v63  ;;  %v485_v55 = vld [vmem:[#allocation7 + $0xa0] sm:$0x3] }
 0x202   :  { %v457_v19 = vsel %vm271_vm15, %v456_v32, %v448_v54 }
 0x203   :  { %v458_v36 = vsel %vm273_vm0, %v457_v19, %v452_v61  ;;  %v627_v61 = vsub.f32 %v3244_v28, %v626_v50  ;;  %v1139_v18 = vand.u32 4294901760, %v1138_v34 }
 0x204   :  { %v460_v43 = vrot.slane %v458_v36, 7  ;;  %v263_v22 = vpop.permute.xlu1 %262  ;;  %v259_v24 = vpop.permute.xlu0 %258  ;;  %v510_v36 = vsel %vm490_vm11, %v485_v55, 0 }
 0x205   :  { %v272_v25 = vsel %vm271_vm15, %v270_v21, %v259_v24  ;;  %v628_v59 = vand.u32 4294901760, %v627_v61  ;;  %v1642_v21 = vand.u32 4294901760, %v3331_v16 }
 0x206   :  { %v274_v38 = vsel %vm273_vm0, %v272_v25, %v263_v22 }
 0x207   :  { %v463_v26 = vsel %vm462_vm1, %v274_v38, %v460_v43 }
 0x208   :  { %v464_v41 = vmax.f32 %v463_v26, 0.0 }
 0x20a   :  { %v488_v49 = vsel %vm486_vm2, %v464_v41, 0 }
 0x20b   :  { %v3250_v30 = vand.u32 4294901760, %v488_v49 }
 0x20d   :  { %v3255_v31 = vsub.f32 %v488_v49, %v3250_v30 }
 0x20f   :  { %v3260_v6 = vand.u32 4294901760, %v3255_v31 }
 0x211   :  { %v586_v54 = vsub.f32 %v3255_v31, %v3260_v6 }
 0x213   :  { %v3276_v2 = vand.u32 4294901760, %v586_v54 }
 0x215   :  { %588 = vmatmul.mubr.f32.vlgmr.msra.gmra.mrb[0].mxu0 %v3276_v2  ;;  %1105 = vmatmul.mubr.f32.vlgmr.msra.gmra.mrb[0].mxu1 %v3276_v2 }
 0x216   :  { %2694 = vmatpush1.bf16.msra.mxu0 %v3213_v45  ;;  %2718 = vmatpush1.bf16.msra.mxu1 %v2717_v39  ;;  %v484_v45 = vld [vmem:[#allocation7 + $0x98] sm:$0x3]  ;;  %v2064_v39 = vand.u32 4294901760, %v471_v4 }
 0x217   :  { %623 = vmatprep.subr.mxu0 %v622_v3  ;;  %1140 = vmatprep.subr.mxu1 %v1139_v18 }
 0x218   :  { %688 = vmatprep.mubr.f32.mxu0 %v2936_v12  ;;  %1205 = vmatprep.mubr.f32.mxu1 %v2936_v12  ;;  %v3347_v19 = vsub.f32 %v471_v4, %v2064_v39 }
 0x21a   :  { %629 = vmatpush1.msra.mxu0 %v628_v59  ;;  %1146 = vmatpush1.msra.mxu1 %v1145_v14  ;;  %v2144_v38 = vand.u32 4294901760, %v3347_v19 }
 0x21b   :  { %2696 = vmatprep.subr.bf16.mxu0 %v2695_v35  ;;  %2720 = vmatprep.subr.bf16.mxu1 %v2719_v40  ;;  %v1548_v35 = vand.u32 4294901760, %v3313_v57  ;;  %v2067_v40 = vand.u32 4294901760, %v478_v8 }
 0x21d   :  { %690 = vmatmul.mubr.f32.vlgmr.msra.gmra.mrb[0].mxu0 %v3250_v30  ;;  %1207 = vmatmul.mubr.f32.vlgmr.msra.gmra.mrb[0].mxu1 %v3250_v30  ;;  %v3349_v20 = vsub.f32 %v478_v8, %v2067_v40  ;;  %v3394_v49 = vpack.c.bf16 %v2067_v40, %v2064_v39 }
 0x21e   :  { %2698 = vmatpush1.bf16.msra.mxu0 %v2697_v37  ;;  %2722 = vmatpush1.bf16.msra.mxu1 %v2721_v0  ;;  %v1552_v37 = vand.u32 4294901760, %v476_v58  ;;  %v507_v0 = vsel %vm490_vm11, %v484_v45, 0 }
 0x21f   :  { %710 = vmatprep.subr.mxu0 %v3236_v27  ;;  %1227 = vmatprep.subr.mxu1 %v3240_v23  ;;  %v3340_v17 = vand.u32 4294901760, %v507_v0  ;;  %v2151_v26 = vand.u32 4294901760, %v3349_v20  ;;  %v3373_v27 = vpack.c.bf16 %v1550_v62, %v1546_v60  ;;  %v2766_v4 = vpack.c.bf16 %v3349_v20, %v3347_v19 }
 0x220   :  { %772 = vmatprep.mubr.f32.mxu0 %v2936_v12  ;;  %1289 = vmatprep.mubr.f32.mxu1 %v2936_v12  ;;  %v3392_v41 = vpack.c.bf16 %v1552_v37, %v1548_v35 }
 0x221   :  { %v2772_v45 = vpack.c.bf16 %v2151_v26, %v2144_v38 }
 0x222   :  { %713 = vmatpush1.msra.mxu0 %v3244_v28  ;;  %1230 = vmatpush1.msra.mxu1 %v3248_v29 }
 0x223   :  { %2700 = vmatprep.subr.bf16.mxu0 %v3138_v46  ;;  %2724 = vmatprep.subr.bf16.mxu1 %v3144_v56 }
 0x225   :  { %775 = vmatmul.mubr.f32.vlgmr.msra.gmra.mrb[0].mxu0 %v3255_v31  ;;  %1292 = vmatmul.mubr.f32.vlgmr.msra.gmra.mrb[0].mxu1 %v3255_v31 }
 0x226   :  { %2702 = vmatpush1.bf16.msra.mxu0 %v3153_v47  ;;  %2726 = vmatpush1.bf16.msra.mxu1 %v3169_v7 }
 0x227   :  { %790 = vmatprep.subr.mxu0 %v3176_v9  ;;  %1307 = vmatprep.subr.mxu1 %v3180_v10 }
 0x228   :  { %851 = vmatprep.mubr.f32.mxu0 %v2936_v12  ;;  %1368 = vmatprep.mubr.f32.mxu1 %v2936_v12 }
 0x22a   :  { %792 = vmatpush1.msra.mxu0 %v3183_v11  ;;  %1309 = vmatpush1.msra.mxu1 %v3193_v15 }
 0x22b   :  { %2704 = vmatprep.subr.bf16.mxu0 %v3224_v42  ;;  %2728 = vmatprep.subr.bf16.mxu1 %v3228_v51  ;;  %v483_v42 = vld [vmem:[#allocation7 + $0x90] sm:$0x3]  ;;  %v3329_v51 = vsub.f32 %v470_v48, %v1546_v60 }
 0x22c   :  { %v504_v32 = vsel %vm490_vm11, %v483_v42, 0 }
 0x22d   :  { %855 = vmatmul.mubr.f32.vlgmr.msra.gmra.mrb[0].mxu0 %v3260_v6  ;;  %1372 = vmatmul.mubr.f32.vlgmr.msra.gmra.mrb[0].mxu1 %v3260_v6  ;;  %v1630_v43 = vand.u32 4294901760, %v3329_v51  ;;  %v3356_v22 = vand.u32 4294901760, %v504_v32  ;;  %v2743_v60 = vpack.c.bf16 %v3331_v16, %v3329_v51 }
 0x22e   :  { %2706 = vmatpush1.bf16.msra.mxu0 %v3226_v44  ;;  %2730 = vmatpush1.bf16.msra.mxu1 %v3230_v53  ;;  %v3336_v44 = vsub.f32 %v3313_v57, %v1548_v35  ;;  %v3338_v53 = vsub.f32 %v476_v58, %v1552_v37  ;;  %v2547_v37 = vlaneseq }
 0x22f   :  { %880 = vmatprep.subr.mxu0 %v620_v52  ;;  %1397 = vmatprep.subr.mxu1 %v1137_v5  ;;  %v1631_v23 = vsub.f32 %v3329_v51, %v1630_v43  ;;  %v2145_v52 = vsub.f32 %v3347_v19, %v2144_v38  ;;  %v2152_v5 = vsub.f32 %v3349_v20, %v2151_v26 }
 0x230   :  { %943 = vmatprep.mubr.f32.mxu0 %v2936_v12  ;;  %1460 = vmatprep.mubr.f32.mxu1 %v2936_v12  ;;  %v1636_v24 = vand.u32 4294901760, %v3336_v44  ;;  %v1648_v25 = vand.u32 4294901760, %v3338_v53  ;;  %v2751_v8 = vpack.c.bf16 %v1642_v21, %v1630_v43  ;;  %v2548_v40 = vshrl.u32 %v2547_v37, 7 }
 0x231   :  { %v2146_v61 = vand.u32 4294901760, %v2145_v52  ;;  %v2153_v63 = vand.u32 4294901760, %v2152_v5 }
 0x232   :  { %884 = vmatpush1.msra.mxu0 %v626_v50  ;;  %1401 = vmatpush1.msra.mxu1 %v1143_v33  ;;  %v2937_v50 = vmov 0.0|0.0   ;;  %v1632_v33 = vand.u32 4294901760, %v1631_v23 }
 0x233   :  { %2708 = vmatprep.subr.bf16.mxu0 %v3138_v46  ;;  %2732 = vmatprep.subr.bf16.mxu1 %v3144_v56  ;;  %v3363_v46 = vsub.f32 %v507_v0, %v3340_v17  ;;  %v3367_v56 = vand.u32 4294901760, %v510_v36  ;;  %v2763_v1 = vpack.c.bf16 %v2153_v63, %v2146_v61 }
 0x235   :  { %945 = vmatmul.mubr.f32.vlgmr.msra.gmra.mrb[0].mxu0 %v3250_v30  ;;  %1462 = vmatmul.mubr.f32.vlgmr.msra.gmra.mrb[0].mxu1 %v3250_v30  ;;  %v1654_v28 = vand.u32 4294901760, %v3363_v46  ;;  %v3400_v29 = vsub.f32 %v510_v36, %v3367_v56 }
 0x236   :  { %2710 = vmatpush1.bf16.msra.mxu0 %v3153_v47  ;;  %2734 = vmatpush1.bf16.msra.mxu1 %v3169_v7  ;;  %v1643_v47 = vsub.f32 %v3331_v16, %v1642_v21  ;;  %v3384_v7 = vsub.f32 %v504_v32, %v3356_v22 }
 0x237   :  { %960 = vmatprep.subr.mxu0 %v3176_v9  ;;  %1477 = vmatprep.subr.mxu1 %v3180_v10  ;;  %v1637_v9 = vsub.f32 %v3336_v44, %v1636_v24  ;;  %v1649_v10 = vsub.f32 %v3338_v53, %v1648_v25  ;;  %v1655_v54 = vsub.f32 %v3363_v46, %v1654_v28  ;;  %v2158_v3 = vand.u32 4294901760, %v3400_v29 }
 0x238   :  { %1021 = vmatprep.mubr.f32.mxu0 %v2936_v12  ;;  %1538 = vmatprep.mubr.f32.mxu1 %v2936_v12  ;;  %v1660_v34 = vand.u32 4294901760, %v3384_v7 }
 0x239   :  { %v1638_v13 = vand.u32 4294901760, %v1637_v9  ;;  %v1656_v48 = vand.u32 4294901760, %v1655_v54  ;;  %v2159_v57 = vsub.f32 %v3400_v29, %v2158_v3 }
 0x23a   :  { %962 = vmatpush1.msra.mxu0 %v3183_v11  ;;  %1479 = vmatpush1.msra.mxu1 %v3193_v15  ;;  %v1644_v11 = vand.u32 4294901760, %v1643_v47  ;;  %v1650_v15 = vand.u32 4294901760, %v1649_v10  ;;  %v1661_v14 = vsub.f32 %v3384_v7, %v1660_v34 }
 0x23b   :  { %2736 = vmatprep.subr.bf16.mxu0 %v3373_v27  ;;  %2759 = vmatprep.subr.bf16.mxu1 %v2937_v50  ;;  %v2160_v62 = vand.u32 4294901760, %v2159_v57 }
 0x23c   :  { %v2739_v18 = vpack.c.bf16 %v1644_v11, %v1632_v33  ;;  %v2741_v59 = vpack.c.bf16 %v1650_v15, %v1638_v13  ;;  %v1662_v58 = vand.u32 4294901760, %v1661_v14 }
 0x23d   :  { %1023 = vmatmul.mubr.f32.vlgmr.msra.gmra.mrb[0].mxu0 %v3250_v30  ;;  %1540 = vmatmul.mubr.f32.vlgmr.msra.gmra.mrb[0].mxu1 %v3250_v30 }
 0x23e   :  { %2738 = vmatpush1.bf16.msra.mxu0 %v3392_v41  ;;  %2761 = vmatpush3.bf16.msra.mxu1 %v3394_v49 }
 0x23f   :  { %1555 = vmatprep.subr.mxu0 %v3340_v17  ;;  %2637 = vmatprep.subr.mxu1 %v2936_v12 }
 0x240   :  { %1616 = vmatprep.mubr.f32.mxu0 %v2936_v12  ;;  %2639 = vmatprep.mubr.msk.f32.mxu1 %vm2938_vm3, %v2936_v12 }
 0x242   :  { %1557 = vmatpush1.msra.mxu0 %v3356_v22  ;;  %2638 = vmatpush3.msra.mxu1 %v3367_v56 }
 0x243   :  { %1622 = vmatmul.mubr.f32.vlgmr.msra.gmra.mrb[2].mxu0 %v3276_v2  ;;  %2740 = vmatprep.subr.bf16.mxu0 %v2739_v18 }
 0x244   :  { %2640 = vmatmul.mubr.f32.vlgmr.msra.gmra.mrb[2].mxu1 %v3276_v2  ;;  %2742 = vmatpush1.bf16.msra.mxu0 %v2741_v59  ;;  %v2745_v2 = vpack.c.bf16 %v3338_v53, %v3336_v44 }
 0x245   :  { %2762 = vmatprep.subr.bf16.mxu1 %v2937_v50  ;;  %1657 = vmatprep.subr.mxu0 %v1656_v48 }
 0x246   :  { %2764 = vmatpush3.bf16.msra.mxu1 %v2763_v1  ;;  %1722 = vmatprep.mubr.f32.mxu0 %v2936_v12 }
 0x247   :  { %2646 = vmatprep.subr.mxu1 %v2936_v12  ;;  %2648 = vmatprep.mubr.msk.f32.mxu1 %vm2938_vm3, %v2936_v12 }
 0x248   :  { %1663 = vmatpush1.msra.mxu0 %v1662_v58 }
 0x249   :  { %2744 = vmatprep.subr.bf16.mxu0 %v2743_v60 }
 0x24a   :  { %2647 = vmatpush3.msra.mxu1 %v2160_v62 }
 0x24b   :  { %1724 = vmatmul.mubr.f32.vlgmr.msra.gmra.mrb[2].mxu0 %v3250_v30  ;;  %2765 = vmatprep.subr.bf16.mxu1 %v2937_v50 }
 0x24c   :  { %2649 = vmatmul.mubr.f32.vlgmr.msra.gmra.mrb[2].mxu1 %v3250_v30  ;;  %2746 = vmatpush1.bf16.msra.mxu0 %v2745_v2 }
 0x24d   :  { %2767 = vmatpush3.bf16.msra.mxu1 %v2766_v4  ;;  %1744 = vmatprep.subr.mxu0 %v3363_v46 }
 0x24e   :  { %2655 = vmatprep.subr.mxu1 %v2936_v12  ;;  %1806 = vmatprep.mubr.f32.mxu0 %v2936_v12 }
 0x24f   :  { %2657 = vmatprep.mubr.msk.f32.mxu1 %vm2938_vm3, %v2936_v12 }
 0x250   :  { %1747 = vmatpush1.msra.mxu0 %v3384_v7 }
 0x251   :  { %2656 = vmatpush3.msra.mxu1 %v3400_v29  ;;  %2748 = vmatprep.subr.bf16.mxu0 %v3373_v27 }
 0x252   :  { %2768 = vmatprep.subr.bf16.mxu1 %v2937_v50 }
 0x253   :  { %1809 = vmatmul.mubr.f32.vlgmr.msra.gmra.mrb[2].mxu0 %v3255_v31 }
 0x254   :  { %2658 = vmatmul.mubr.f32.vlgmr.msra.gmra.mrb[2].mxu1 %v3255_v31  ;;  %2750 = vmatpush1.bf16.msra.mxu0 %v3392_v41  ;;  %v2753_v31 = vpack.c.bf16 %v1648_v25, %v1636_v24 }
 0x255   :  { %2770 = vmatpush3.bf16.msra.mxu1 %v3394_v49  ;;  %1824 = vmatprep.subr.mxu0 %v3340_v17 }
 0x256   :  { %2664 = vmatprep.subr.mxu1 %v2936_v12  ;;  %1885 = vmatprep.mubr.f32.mxu0 %v2936_v12 }
 0x257   :  { %2666 = vmatprep.mubr.msk.f32.mxu1 %vm2938_vm3, %v2936_v12 }
 0x258   :  { %1826 = vmatpush1.msra.mxu0 %v3356_v22 }
 0x259   :  { %2665 = vmatpush3.msra.mxu1 %v3367_v56  ;;  %2752 = vmatprep.subr.bf16.mxu0 %v2751_v8 }
 0x25a   :  { %2771 = vmatprep.subr.bf16.mxu1 %v2937_v50 }
 0x25b   :  { %1889 = vmatmul.mubr.f32.vlgmr.msra.gmra.mrb[2].mxu0 %v3260_v6 }
 0x25c   :  { %2667 = vmatmul.mubr.f32.vlgmr.msra.gmra.mrb[2].mxu1 %v3260_v6  ;;  %2754 = vmatpush1.bf16.msra.mxu0 %v2753_v31  ;;  %v2939_v6 = vmov 1983009808  }
 0x25d   :  { %2773 = vmatpush3.bf16.msra.mxu1 %v2772_v45  ;;  %1914 = vmatprep.subr.mxu0 %v1654_v28  ;;  %v2545_v35 = vunpack.c.l.s4 %v2939_v6 }
 0x25e   :  { %2673 = vmatprep.subr.mxu1 %v2936_v12  ;;  %1977 = vmatprep.mubr.f32.mxu0 %v2936_v12 }
 0x25f   :  { %2675 = vmatprep.mubr.msk.f32.mxu1 %vm2938_vm3, %v2936_v12  ;;  %v2546_v39 = vunpack.c.0.s8 %v2545_v35 }
 0x260   :  { %1918 = vmatpush1.msra.mxu0 %v1660_v34 }
 0x261   :  { %2674 = vmatpush3.msra.mxu1 %v2158_v3  ;;  %2756 = vmatprep.subr.bf16.mxu0 %v3373_v27  ;;  %v2549_v51 = vsub.s32 %v2546_v39, %v2548_v40 }
 0x262   :  { %2774 = vmatprep.subr.bf16.mxu1 %v2937_v50 }
 0x263   :  { %1979 = vmatmul.mubr.f32.vlgmr.msra.gmra.mrb[2].mxu0 %v3250_v30 }
 0x264   :  { %2676 = vmatmul.mubr.f32.vlgmr.msra.gmra.mrb[2].mxu1 %v3250_v30  ;;  %2758 = vmatpush1.bf16.msra.mxu0 %v3392_v41 }
 0x265   :  { %2776 = vmatpush3.bf16.msra.mxu1 %v3394_v49  ;;  %1994 = vmatprep.subr.mxu0 %v3340_v17 }
 0x266   :  { %2682 = vmatprep.subr.mxu1 %v2936_v12  ;;  %2055 = vmatprep.mubr.f32.mxu0 %v2936_v12 }
 0x267   :  { %2684 = vmatprep.mubr.msk.f32.mxu1 %vm2938_vm3, %v2936_v12 }
 0x268   :  { %1996 = vmatpush1.msra.mxu0 %v3356_v22 }
 0x269   :  { %2683 = vmatpush3.msra.mxu1 %v3367_v56 }
 0x26b   :  { %2057 = vmatmul.mubr.f32.vlgmr.msra.gmra.mrb[2].mxu0 %v3250_v30 }
 0x26c   :  { %2685 = vmatmul.mubr.f32.vlgmr.msra.gmra.mrb[2].mxu1 %v3250_v30 }
 0x310   :  { %v1024_v0 = vpop.f32.mrb[0].mxu0  ;;  %v1541_v42 = vpop.f32.mrb[0].mxu1 }
 0x311   :  { %v1026_v16 = vpop.f32.mrb[1].mxu0  ;;  %v1543_v44 = vpop.f32.mrb[1].mxu1 }
 0x312   :  { %v2542_v53 = vcombine.low %v1024_v0, %v1026_v16  ;;  %v2543_v12 = vcombine.low %v1541_v42, %v1543_v44 }
 0x314   :  { %v2550_v55 = vrot.slane %v2542_v53, %v2549_v51  ;;  %v2557_v17 = vrot.slane %v2543_v12, %v2549_v51 }
 0x316   :  { %v2558_v32 = vcombine.low %v2550_v55, %v2557_v17 }
 0x318   :  { %2577 = vst [vmem:[#allocation9] sm:$0xff] %v2558_v32 }
 0x33e   :  { %v2058_v19 = vpop.f32.mrb[2].mxu0 }
 0x33f   :  { %v2531_v20 = vpop.f32.mrb[2].mxu1  ;;  %v2060_v30 = vpop.f32.mrb[3].mxu0 }
 0x340   :  { %v2559_v36 = vcombine.low %v2058_v19, %v2060_v30  ;;  %v2686_v43 = vpop.f32.mrb[3].mxu1  ;;  %v2573_v21 = vrot.slane %v2531_v20, %v2549_v51 }
 0x342   :  { %v2566_v22 = vrot.slane %v2559_v36, %v2549_v51 }
 0x344   :  { %v2574_v24 = vcombine.low %v2566_v22, %v2573_v21 }
 0x346   :  { %2582 = vst.msk [vmem:[#allocation9 + $0x8] sm:$0x3f] %vm2581_vm7, %v2574_v24 }
 0x347   :  { %2903 = shalt.err (!%p2900_p11)
}
 0x348   :  { %s2904_s9 = scalar_lea.hbm %s3524_s3, 224 }
 0x349   :  { %p2905_p12 = scmp.ne.s32.totalorder %s3524_s3, %s2904_s9  ;;  %p2908_p13 = scmp.lt.u32.totalorder %s2904_s9, %s3524_s3 }
 0x34b   :  { %p2910_p0 = pnand %p2908_p13, %p2905_p12 }
 0x34d   :  { %2913 = shalt.err (!%p2910_p0)
}
 0x34e   :  { %2592 = dma.vmem_to_hbm [thread:$0]  %s2590_s5, 224, %s3524_s3, [#allocation4]  }
 0x34f   :  { %2920 = dma.done.wait [#allocation4], 224  }
 0x350   :  { %2921 = vsyncadd [#allocation4], 4294967072 }
 0x351   :  { %2596 = vsyncpa [#allocation3], 1 }
 0x352   :  { %2597 = vsyncpa [#allocation8], 1 }
 0x353   :  { %2598 = vsyncpa [#allocation4], 1 }
 0x354   :  { %2599 = vsyncpa [#allocation5], 1 }

</bundles_post_ra>
